<compile_context>
chip_gen: v6e
topology: v6e:2x2x1
jax: 0.10.0
libtpu: 0.0.40
codegen_flags: <defaults>
</compile_context>

<pallas_src>
import functools
import math

import jax
import jax.numpy as jnp
from jax.experimental import pallas as pl
from jax.experimental.pallas import tpu as pltpu

DTYPE = jnp.bfloat16                  # activation / weight dtype (f32 accum inside kernels)
_VMEM_LIMIT = 48 * 1024 * 1024        # above 16/32 MiB scoped defaults, safe on v7x's 64 MiB
_LN_EPS = 1e-12
_GELU_C = 0.7978845608028654          # sqrt(2/pi)


def _pick_tile(dim, candidates):
    """Largest candidate that divides dim evenly; else the full dim (single block)."""
    for c in candidates:
        if dim % c == 0:
            return c
    return dim


def _gelu(y):
    # TODO(synk): HF BERT uses erf-exact GELU; tanh approximation used here.
    return 0.5 * y * (1.0 + jnp.tanh(_GELU_C * (y + 0.044715 * y * y * y)))


# -----------------------------------------------------------------------------
# Tiled dense: act(x @ w + b)
# -----------------------------------------------------------------------------
def _dense_kernel(x_ref, w_ref, b_ref, o_ref, acc_ref, *, activation, n_k):
    k = pl.program_id(2)

    @pl.when(k == 0)
    def _():
        acc_ref[...] = jnp.zeros_like(acc_ref)

    acc_ref[...] += jnp.dot(x_ref[...], w_ref[...],
                            preferred_element_type=jnp.float32)

    @pl.when(k == n_k - 1)
    def _():
        y = acc_ref[...] + b_ref[...].astype(jnp.float32)
        if activation == "gelu":
            y = _gelu(y)
        elif activation == "tanh":
            y = jnp.tanh(y)
        o_ref[...] = y.astype(o_ref.dtype)


def dense(x, w, b, activation=None):
    n, kdim = x.shape
    _, m = w.shape
    tm = _pick_tile(n, (512, 256, 128, 8))
    tn = _pick_tile(m, (512, 256, 128))
    tk = _pick_tile(kdim, (512, 256, 128))
    n_k = kdim // tk
    return pl.pallas_call(
        functools.partial(_dense_kernel, activation=activation, n_k=n_k),
        out_shape=jax.ShapeDtypeStruct((n, m), x.dtype),
        grid=(n // tm, m // tn, n_k),
        in_specs=[
            pl.BlockSpec((tm, tk), lambda i, j, k: (i, k)),
            pl.BlockSpec((tk, tn), lambda i, j, k: (k, j)),
            pl.BlockSpec((1, tn), lambda i, j, k: (0, j)),
        ],
        out_specs=pl.BlockSpec((tm, tn), lambda i, j, k: (i, j)),
        scratch_shapes=[pltpu.VMEM((tm, tn), jnp.float32)],
        compiler_params=pltpu.CompilerParams(
            dimension_semantics=("parallel", "parallel", "arbitrary"),
            vmem_limit_bytes=_VMEM_LIMIT),
    )(x, w, b.reshape(1, m))


# -----------------------------------------------------------------------------
# Tiled dense with fused bias + residual-add + LayerNorm epilogue
# -----------------------------------------------------------------------------
def _dense_add_ln_kernel(x_ref, w_ref, b_ref, r_ref, g_ref, be_ref, o_ref,
                         acc_ref, *, n_k, eps):
    k = pl.program_id(1)

    @pl.when(k == 0)
    def _():
        acc_ref[...] = jnp.zeros_like(acc_ref)

    acc_ref[...] += jnp.dot(x_ref[...], w_ref[...],
                            preferred_element_type=jnp.float32)

    @pl.when(k == n_k - 1)
    def _():
        y = (acc_ref[...] + b_ref[...].astype(jnp.float32)
             + r_ref[...].astype(jnp.float32))
        mu = jnp.mean(y, axis=-1, keepdims=True)
        var = jnp.mean(jnp.square(y - mu), axis=-1, keepdims=True)
        y = (y - mu) * jax.lax.rsqrt(var + eps)
        o_ref[...] = (y * g_ref[...].astype(jnp.float32)
                      + be_ref[...].astype(jnp.float32)).astype(o_ref.dtype)


def dense_add_layernorm(x, w, b, residual, gamma, beta, eps=_LN_EPS):
    """LayerNorm(x @ w + b + residual); keeps the full hidden row resident."""
    n, kdim = x.shape
    _, m = w.shape
    tm = _pick_tile(n, (512, 256, 128, 8))
    tk = _pick_tile(kdim, (512, 256, 128))
    n_k = kdim // tk
    return pl.pallas_call(
        functools.partial(_dense_add_ln_kernel, n_k=n_k, eps=eps),
        out_shape=jax.ShapeDtypeStruct((n, m), x.dtype),
        grid=(n // tm, n_k),
        in_specs=[
            pl.BlockSpec((tm, tk), lambda i, k: (i, k)),
            pl.BlockSpec((tk, m), lambda i, k: (k, 0)),
            pl.BlockSpec((1, m), lambda i, k: (0, 0)),
            pl.BlockSpec((tm, m), lambda i, k: (i, 0)),
            pl.BlockSpec((1, m), lambda i, k: (0, 0)),
            pl.BlockSpec((1, m), lambda i, k: (0, 0)),
        ],
        out_specs=pl.BlockSpec((tm, m), lambda i, k: (i, 0)),
        scratch_shapes=[pltpu.VMEM((tm, m), jnp.float32)],
        compiler_params=pltpu.CompilerParams(
            dimension_semantics=("parallel", "arbitrary"),
            vmem_limit_bytes=_VMEM_LIMIT),
    )(x, w, b.reshape(1, m), residual, gamma.reshape(1, m), beta.reshape(1, m))


# -----------------------------------------------------------------------------
# Fused FFN: LayerNorm(gelu(x @ Wi + bi) @ Wo2 + bo2 + x)
# -----------------------------------------------------------------------------
def _ffn_kernel(x_ref, wi_ref, bi_ref, wo_ref, bo_ref, g_ref, be_ref, o_ref, *, eps):
    x = x_ref[...]
    inter = jnp.dot(x, wi_ref[...], preferred_element_type=jnp.float32)
    inter = _gelu(inter + bi_ref[...].astype(jnp.float32))
    y = jnp.dot(inter.astype(wo_ref.dtype), wo_ref[...],
                preferred_element_type=jnp.float32)
    y = y + bo_ref[...].astype(jnp.float32) + x.astype(jnp.float32)
    mu = jnp.mean(y, axis=-1, keepdims=True)
    var = jnp.mean(jnp.square(y - mu), axis=-1, keepdims=True)
    y = (y - mu) * jax.lax.rsqrt(var + eps)
    o_ref[...] = (y * g_ref[...].astype(jnp.float32)
                  + be_ref[...].astype(jnp.float32)).astype(o_ref.dtype)


def ffn_fused(x, wi, bi, wo2, bo2, gamma, beta, eps=_LN_EPS):
    n, h = x.shape
    _, inter_dim = wi.shape
    tm = _pick_tile(n, (512, 256, 128, 8))
    return pl.pallas_call(
        functools.partial(_ffn_kernel, eps=eps),
        out_shape=jax.ShapeDtypeStruct((n, h), x.dtype),
        grid=(n // tm,),
        in_specs=[
            pl.BlockSpec((tm, h), lambda i: (i, 0)),
            pl.BlockSpec((h, inter_dim), lambda i: (0, 0)),
            pl.BlockSpec((1, inter_dim), lambda i: (0, 0)),
            pl.BlockSpec((inter_dim, h), lambda i: (0, 0)),
            pl.BlockSpec((1, h), lambda i: (0, 0)),
            pl.BlockSpec((1, h), lambda i: (0, 0)),
            pl.BlockSpec((1, h), lambda i: (0, 0)),
        ],
        out_specs=pl.BlockSpec((tm, h), lambda i: (i, 0)),
        compiler_params=pltpu.CompilerParams(
            dimension_semantics=("parallel",),
            vmem_limit_bytes=_VMEM_LIMIT),
    )(x, wi, bi.reshape(1, inter_dim), wo2, bo2.reshape(1, h),
      gamma.reshape(1, h), beta.reshape(1, h))


# -----------------------------------------------------------------------------
# Plain row-tiled LayerNorm (embeddings; no fake zeros residual)
# -----------------------------------------------------------------------------
def _ln_kernel(x_ref, g_ref, b_ref, o_ref, *, eps):
    x = x_ref[...].astype(jnp.float32)
    mu = jnp.mean(x, axis=-1, keepdims=True)
    var = jnp.mean(jnp.square(x - mu), axis=-1, keepdims=True)
    y = (x - mu) * jax.lax.rsqrt(var + eps)
    o_ref[...] = (y * g_ref[...].astype(jnp.float32)
                  + b_ref[...].astype(jnp.float32)).astype(o_ref.dtype)


def layernorm(x, gamma, beta, eps=_LN_EPS):
    n, h = x.shape
    tm = _pick_tile(n, (512, 256, 128, 8))
    return pl.pallas_call(
        functools.partial(_ln_kernel, eps=eps),
        out_shape=jax.ShapeDtypeStruct((n, h), x.dtype),
        grid=(n // tm,),
        in_specs=[pl.BlockSpec((tm, h), lambda i: (i, 0)),
                  pl.BlockSpec((1, h), lambda i: (0, 0)),
                  pl.BlockSpec((1, h), lambda i: (0, 0))],
        out_specs=pl.BlockSpec((tm, h), lambda i: (i, 0)),
        compiler_params=pltpu.CompilerParams(
            dimension_semantics=("parallel",),
            vmem_limit_bytes=_VMEM_LIMIT),
    )(x, gamma.reshape(1, h), beta.reshape(1, h))


# -----------------------------------------------------------------------------
# Attention: all heads of one batch element per grid step, lane-dense output
# -----------------------------------------------------------------------------
def _attn_kernel(qkv_ref, bias_ref, o_ref, *, num_heads, head_dim, scale):
    h_tot = num_heads * head_dim
    qkv = qkv_ref[0]                      # (S, 3H)
    bias = bias_ref[0]                    # (1, S) f32, broadcasts over (S, S)
    scale_c = jnp.asarray(scale, dtype=qkv.dtype)
    ctxs = []
    for h in range(num_heads):            # static unroll over heads
        lo, hi = h * head_dim, (h + 1) * head_dim
        q = qkv[:, lo:hi] * scale_c                       # scale folded into q
        k = qkv[:, h_tot + lo:h_tot + hi]
        v = qkv[:, 2 * h_tot + lo:2 * h_tot + hi]
        s = jax.lax.dot_general(q, k, (((1,), (1,)), ((), ())),
                                preferred_element_type=jnp.float32)
        s = s + bias
        s = s - jnp.max(s, axis=-1, keepdims=True)
        p = jnp.exp(s)
        p = p * pl.reciprocal(jnp.sum(p, axis=-1, keepdims=True), approx=True)
        ctxs.append(jnp.dot(p.astype(v.dtype), v,
                            preferred_element_type=jnp.float32))
    # single (S, H) store — lane-dense, no XLA-side head transpose afterwards
    o_ref[0] = jnp.concatenate(ctxs, axis=-1).astype(o_ref.dtype)


def attention(qkv, bias, num_heads, head_dim):
    b, s, three_h = qkv.shape
    h_tot = num_heads * head_dim
    scale = 1.0 / math.sqrt(head_dim)
    return pl.pallas_call(
        functools.partial(_attn_kernel, num_heads=num_heads,
                          head_dim=head_dim, scale=scale),
        out_shape=jax.ShapeDtypeStruct((b, s, h_tot), qkv.dtype),
        grid=(b,),
        in_specs=[pl.BlockSpec((1, s, three_h), lambda i: (i, 0, 0)),
                  pl.BlockSpec((1, 1, s), lambda i: (i, 0, 0))],
        out_specs=pl.BlockSpec((1, s, h_tot), lambda i: (i, 0, 0)),
        compiler_params=pltpu.CompilerParams(
            dimension_semantics=("parallel",),
            vmem_limit_bytes=_VMEM_LIMIT),
    )(qkv, bias)


# -----------------------------------------------------------------------------
# Deterministic synthetic BERT parameters (stand-in for BertModel.from_pretrained)
# -----------------------------------------------------------------------------
def init_params(key, cfg):
    H, I = cfg["hidden"], cfg["intermediate"]
    std = 0.02

    def nrm(k, shape):
        return (std * jax.random.normal(k, shape, dtype=jnp.float32)).astype(DTYPE)

    keys = iter(jax.random.split(key, 8 + 4 * cfg["layers"]))
    params = {
        "word_emb": nrm(next(keys), (cfg["vocab"], H)),
        "pos_emb": nrm(next(keys), (cfg["max_length"], H)),
        "type_emb": nrm(next(keys), (2, H)),
        "emb_ln_g": jnp.ones((H,), DTYPE),
        "emb_ln_b": jnp.zeros((H,), DTYPE),
        "pool_w": nrm(next(keys), (H, H)),
        "pool_b": jnp.zeros((H,), DTYPE),
        "layers": [],
    }
    for _ in range(cfg["layers"]):
        params["layers"].append({
            # Q/K/V fused into a single (H, 3H) projection: one matmul, x read once
            "wqkv": nrm(next(keys), (H, 3 * H)), "bqkv": jnp.zeros((3 * H,), DTYPE),
            "wo": nrm(next(keys), (H, H)), "bo": jnp.zeros((H,), DTYPE),
            "ln1_g": jnp.ones((H,), DTYPE), "ln1_b": jnp.zeros((H,), DTYPE),
            "wi": nrm(next(keys), (H, I)), "bi": jnp.zeros((I,), DTYPE),
            "wo2": nrm(next(keys), (I, H)), "bo2": jnp.zeros((H,), DTYPE),
            "ln2_g": jnp.ones((H,), DTYPE), "ln2_b": jnp.zeros((H,), DTYPE),
        })
    return params


# -----------------------------------------------------------------------------
# Forward pass (mirrors BERTConceptSentenceEncoder.forward)
# -----------------------------------------------------------------------------
def bert_concept_encoder_forward(params, inputs, cfg,
                                 sentenceORword="word", cat_entity_rep=False):
    ids = inputs["word"]                      # (B, S) int32
    mask = inputs["mask"]                     # (B, S)
    B, S = ids.shape
    H, nH = cfg["hidden"], cfg["heads"]
    dH = H // nH

    # --- embeddings (gathers are XLA glue), then a plain LN kernel ---
    # TODO(synk): token_type embeddings hard-coded to segment 0 (token_type_ids=None path).
    we = jnp.take(params["word_emb"], ids, axis=0).astype(jnp.float32)   # (B, S, H)
    pe = params["pos_emb"][:S].astype(jnp.float32)[None, :, :]           # (1, S, H)
    te = params["type_emb"][0].astype(jnp.float32)[None, None, :]        # (1, 1, H)
    emb = (we + pe + te).astype(DTYPE).reshape(B * S, H)
    x = layernorm(emb, params["emb_ln_g"], params["emb_ln_b"])

    # additive attention mask, like BERT's extended_attention_mask (kept f32)
    bias = ((1.0 - mask.astype(jnp.float32)) * -10000.0).reshape(B, 1, S)

    for layer in params["layers"]:
        qkv = dense(x, layer["wqkv"], layer["bqkv"])                 # (B*S, 3H)
        ctx = attention(qkv.reshape(B, S, 3 * H), bias, nH, dH)      # (B, S, H)
        x = dense_add_layernorm(ctx.reshape(B * S, H), layer["wo"], layer["bo"],
                                x, layer["ln1_g"], layer["ln1_b"])
        x = ffn_fused(x, layer["wi"], layer["bi"], layer["wo2"], layer["bo2"],
                      layer["ln2_g"], layer["ln2_b"])

    seq = x.reshape(B, S, H)                                         # outputs[0]

    # pooler: tiny (B, H) matmul — plain JAX (a pallas_call cannot amortize here)
    cls = seq[:, 0, :].astype(jnp.float32)
    pooled = jnp.tanh(cls @ params["pool_w"].astype(jnp.float32)
                      + params["pool_b"].astype(jnp.float32)).astype(DTYPE)

    if cat_entity_rep:
        rng = jnp.arange(B)
        h_state = seq[rng, inputs["pos1"]]
        t_state = seq[rng, inputs["pos2"]]
        return jnp.concatenate([h_state, t_state], axis=-1)
    if sentenceORword == "sentence":
        return pooled
    return seq, pooled                                               # 'word' mode


# -----------------------------------------------------------------------------
if __name__ == "__main__":
    cfg = dict(vocab=30, max_length=8, hidden=32, heads=2,
               intermediate=64, layers=2)
    B, S = 2, cfg["max_length"]

    key = jax.random.PRNGKey(0)
    k_params, k_ids = jax.random.split(key)
    params = init_params(k_params, cfg)

    ids = jax.random.randint(k_ids, (B, S), 0, cfg["vocab"], dtype=jnp.int32)
    mask = jnp.ones((B, S), jnp.int32).at[:, -2:].set(0)   # pad last 2 tokens
    inputs = {
        "word": ids,
        "mask": mask,
        "pos1": jnp.array([1, 2], jnp.int32),
        "pos2": jnp.array([3, 4], jnp.int32),
    }

    # 'word' mode: (sequence hidden states, pooled sentence embedding)
    word_emb, sent_emb = bert_concept_encoder_forward(
        params, inputs, cfg, sentenceORword="word", cat_entity_rep=False)
    # cat_entity_rep mode: concat of pos1/pos2 hidden states
    state = bert_concept_encoder_forward(
        params, inputs, cfg, cat_entity_rep=True)

    jax.block_until_ready((word_emb, sent_emb, state))
    assert word_emb.shape == (B, S, cfg["hidden"])
    assert sent_emb.shape == (B, cfg["hidden"])
    assert state.shape == (B, 2 * cfg["hidden"])
    print("KERNEL_OK")
</pallas_src>

<mosaic_0001>
module attributes {stable_mosaic.version = 11 : i64} {
  func.func @_ln_kernel(%arg0: i32, %arg1: memref<8x32xbf16, #tpu.memory_space<vmem>>, %arg2: memref<1x32xbf16, #tpu.memory_space<vmem>>, %arg3: memref<1x32xbf16, #tpu.memory_space<vmem>>, %arg4: memref<8x32xbf16, #tpu.memory_space<vmem>>) attributes {dimension_semantics = [#tpu.dimension_semantics<parallel>], iteration_bounds = array<i64: 2>, scalar_prefetch = 0 : i64, scratch_operands = 0 : i64, tpu.core_type = #tpu.core_type<tc>, window_params = [{transform_indices = @transform_0, window_bounds = array<i64: 8, 32>}, {pipeline_mode = #tpu.pipeline_mode<synchronous>, transform_indices = @transform_1, window_bounds = array<i64: 1, 32>}, {pipeline_mode = #tpu.pipeline_mode<synchronous>, transform_indices = @transform_2, window_bounds = array<i64: 1, 32>}, {transform_indices = @transform_3, window_bounds = array<i64: 8, 32>}]} {
    %c0 = arith.constant 0 : index
    %c0_0 = arith.constant 0 : index
    %0 = vector.load %arg1[%c0, %c0_0] : memref<8x32xbf16, #tpu.memory_space<vmem>>, vector<8x32xbf16>
    %1 = arith.extf %0 : vector<8x32xbf16> to vector<8x32xf32>
    %cst = arith.constant dense<0.000000e+00> : vector<8xf32>
    %2 = vector.multi_reduction <add>, %1, %cst [1] : vector<8x32xf32> to vector<8xf32>
    %3 = vector.shape_cast %2 : vector<8xf32> to vector<8x1xf32>
    %cst_1 = arith.constant 3.200000e+01 : f32
    %4 = vector.broadcast %cst_1 : f32 to vector<8x1xf32>
    %5 = arith.divf %3, %4 : vector<8x1xf32>
    %6 = vector.broadcast %5 : vector<8x1xf32> to vector<8x32xf32>
    %7 = arith.subf %1, %6 : vector<8x32xf32>
    %8 = arith.mulf %7, %7 : vector<8x32xf32>
    %cst_2 = arith.constant dense<0.000000e+00> : vector<8xf32>
    %9 = vector.multi_reduction <add>, %8, %cst_2 [1] : vector<8x32xf32> to vector<8xf32>
    %10 = vector.shape_cast %9 : vector<8xf32> to vector<8x1xf32>
    %cst_3 = arith.constant 3.200000e+01 : f32
    %11 = vector.broadcast %cst_3 : f32 to vector<8x1xf32>
    %12 = arith.divf %10, %11 : vector<8x1xf32>
    %13 = vector.broadcast %5 : vector<8x1xf32> to vector<8x32xf32>
    %14 = arith.subf %1, %13 : vector<8x32xf32>
    %cst_4 = arith.constant 9.99999996E-13 : f32
    %15 = vector.broadcast %cst_4 : f32 to vector<8x1xf32>
    %16 = arith.addf %12, %15 : vector<8x1xf32>
    %17 = math.rsqrt %16 : vector<8x1xf32>
    %18 = vector.broadcast %17 : vector<8x1xf32> to vector<8x32xf32>
    %19 = arith.mulf %14, %18 : vector<8x32xf32>
    %c0_5 = arith.constant 0 : index
    %c0_6 = arith.constant 0 : index
    %20 = vector.load %arg2[%c0_5, %c0_6] : memref<1x32xbf16, #tpu.memory_space<vmem>>, vector<1x32xbf16>
    %21 = arith.extf %20 : vector<1x32xbf16> to vector<1x32xf32>
    %22 = vector.broadcast %21 : vector<1x32xf32> to vector<8x32xf32>
    %23 = arith.mulf %19, %22 : vector<8x32xf32>
    %c0_7 = arith.constant 0 : index
    %c0_8 = arith.constant 0 : index
    %24 = vector.load %arg3[%c0_7, %c0_8] : memref<1x32xbf16, #tpu.memory_space<vmem>>, vector<1x32xbf16>
    %25 = arith.extf %24 : vector<1x32xbf16> to vector<1x32xf32>
    %26 = vector.broadcast %25 : vector<1x32xf32> to vector<8x32xf32>
    %27 = arith.addf %23, %26 : vector<8x32xf32>
    %28 = arith.truncf %27 : vector<8x32xf32> to vector<8x32xbf16>
    %c0_9 = arith.constant 0 : index
    %c0_10 = arith.constant 0 : index
    %29 = vector.load %arg4[%c0_9, %c0_10] : memref<8x32xbf16, #tpu.memory_space<vmem>>, vector<8x32xbf16>
    tpu.vector_store %arg4[%c0_9, %c0_10], %28 {strides = array<i32>} : memref<8x32xbf16, #tpu.memory_space<vmem>>, vector<8x32xbf16>,
    return
  }
  func.func @transform_0(%arg0: i32) -> (i32, i32) {
    %c0_i32 = arith.constant 0 : i32
    %c0_i32_0 = arith.constant 0 : i32
    return %arg0, %c0_i32 : i32, i32
  }
  func.func @transform_1(%arg0: i32) -> (i32, i32) {
    %c0_i32 = arith.constant 0 : i32
    %c0_i32_0 = arith.constant 0 : i32
    %c0_i32_1 = arith.constant 0 : i32
    return %c0_i32, %c0_i32_0 : i32, i32
  }
  func.func @transform_2(%arg0: i32) -> (i32, i32) {
    %c0_i32 = arith.constant 0 : i32
    %c0_i32_0 = arith.constant 0 : i32
    %c0_i32_1 = arith.constant 0 : i32
    return %c0_i32, %c0_i32_0 : i32, i32
  }
  func.func @transform_3(%arg0: i32) -> (i32, i32) {
    %c0_i32 = arith.constant 0 : i32
    %c0_i32_0 = arith.constant 0 : i32
    return %arg0, %c0_i32 : i32, i32
  }
}

</mosaic_0001>

<bundles_post_ra>
// kernel: tpu_custom_call.1
= control target key start
LH: loop header
LB: loop body
LE: loop exit
PB: predicated region body
PF: predicated region fallthrough
CT: control target
= control target key end

     0   :  { %8 = vsyncpa [#allocation3], 0  ;;  %s631_s0 = inlined_call_operand.hbm [shape: bf16[16,32], index: 0, kind: input, shape index: {}]   ;;  %s632_s1 = inlined_call_operand.vmem [shape: bf16[1,32], index: 1, kind: input, shape index: {}]   ;;  %s633_s2 = inlined_call_operand.vmem [shape: bf16[1,32], index: 2, kind: input, shape index: {}]   ;;  %s634_s3 = inlined_call_operand.hbm [shape: bf16[16,32], index: 3, kind: output, shape index: {}]  }
   0x1   :  { %10 = vsyncpa [#allocation3 + $0x1], 0 }
   0x2   :  { %11 = vsyncpa [#allocation4], 0 }
   0x3   :  { %13 = vsyncpa [#allocation4 + $0x1], 0  ;;  %s480_s12 = smov 0   ;;  %s482_s13 = smov 0  }
   0x4   :  { %s484_s14 = smov 0   ;;  %s486_s15 = smov 0  }
   0x5 LB: > { %s501_s16 = sadd.s32 4294967295, %s456_s15   ;;  %s304_s17 = sadd.s32 4294967294, %s456_s15   ;;  %s456_s15 = sphi %s486_s15, %s651_s15   ;;  %s452_s14 = sphi %s484_s14, %s650_s14   ;;  %s448_s13 = sphi %s482_s13, %s649_s13   ;;  %s444_s12 = sphi %s480_s12, %s648_s12  }
   0x6   : > { %s505_s18 = sadd.s32 1, %s456_s15   ;;  %s26_s19 = sadd.s32 1, %s452_s14 }
   0x7   : > { %s23_s20 = ssub.s32 %s456_s15, %s505_s18  ;;  %p33_p0 = scmp.ne.s32.totalorder %s452_s14, %s448_s13 }
   0x8   : > { %p24_p1 = scmp.eq.s32.totalorder %s23_s20, 0  ;;  %p34_p2 = scmp.eq.s32.totalorder %s456_s15, 0 }
   0x9   : > { %p39_p3 = scmp.ne.s32.totalorder %s448_s13, %s444_s12  ;;  %p40_p4 = scmp.eq.s32.totalorder %s501_s16, 0 }
   0xa   : > { %s517_s21 = scalar_select %p24_p1, %s452_s14, %s26_s19  }
   0xb   : > { %p519_p5 = por %p34_p2, %p33_p0  ;;  %p523_p6 = por %p40_p4, %p39_p3 }
   0xc   : > { %p105_p7 = scmp.eq.s32.totalorder %s501_s16, 1  ;;  %p111_p8 = scmp.eq.s32.totalorder %s304_s17, 1 }
   0xd   : > { %s638_s23 = scalar_select %p523_p6, 1, 0 }
   0xe   : > { %p328_p10 = scmp.lt.s32.totalorder %s456_s15, 2  ;;  %p530_p11 = por %p105_p7, %p33_p0 }
   0xf   : > { %p534_p12 = por %p111_p8, %p39_p3  ;;  %s137_s26 = sand.u32 1, %s452_s14  }
  0x10   : > { %s639_s24 = scalar_select %p530_p11, 1, 0 }
  0x11   : > { %s640_s25 = scalar_select %p534_p12, 1, 0 }
  0x12   : > { %s308_s27 = sshll.u32 %s456_s15, 6  ;;  %s307_s28 = sshll.u32 %s137_s26, 2 }
  0x13   : > { %s543_s4 = scalar_lea.hbm %s631_s0, %s308_s27  ;;  %s141_s5 = scalar_lea.vmem [#allocation2], %s307_s28 }
  0x14   : > { %s148_s6 = sshll.u32 %s141_s5, 4  ;;  %p547_p13 = pnand %p328_p10, %p519_p5  ;;  %s551_s6 = int_to_ptr.vmem [resolvable:$true] %s148_s6 }
  0x15   : > { %s138_s8 = scalar_lea.sflag [#allocation3], %s137_s26  ;;  %s364_s9 = scalar_lea.hbm %s543_s4, 64 }
  0x16   : > { %p365_p2 = scmp.ne.s32.totalorder %s543_s4, %s364_s9  ;;  %p366_p3 = pneg %p547_p13 }
  0x17   : > { %s369_s17 = scalar_lea.hbm %s631_s0, 128  ;;  %p370_p5 = scmp.lt.s32.totalorder %s543_s4, %s631_s0 }
  0x18   : > { %p367_p4 = pnand %p366_p3, %p365_p2  ;;  %p371_p8 = scmp.lt.s32.totalorder %s369_s17, %s364_s9 }
  0x1a   : > { %p368_p7 = pneg %p367_p4  ;;  %p372_p10 = por %p371_p8, %p370_p5 }
  0x1c   : > { %p373_p9 = pnand %p372_p10, %p368_p7 }
  0x1e   : > { %376 = shalt.err (!%p373_p9)
}
  0x1f   : > { %s377_s22 = scalar_lea.vmem %s551_s6, 64  ;;  %s458_s26 = smov [#allocation2]  }
  0x20   : > { %p378_p0 = scmp.ne.s32.totalorder %s551_s6, %s377_s22  ;;  %s382_s27 = sshll.u32 %s458_s26, 4  ;;  %s383_s27 = int_to_ptr.vmem [resolvable:$false] %s382_s27 }
  0x21   : > { %s384_s28 = scalar_lea.vmem %s383_s27, 128  ;;  %p385_p4 = scmp.lt.s32.totalorder %s551_s6, %s383_s27 }
  0x22   : > { %p380_p1 = pnand %p378_p0, %p366_p3  ;;  %p386_p12 = scmp.lt.s32.totalorder %s384_s28, %s377_s22 }
  0x24   : > { %p381_p2 = pneg %p380_p1  ;;  %p387_p11 = por %p386_p12, %p385_p4 }
  0x26   : > { %p388_p6 = pnand %p387_p11, %p381_p2 }
  0x28   : > { %391 = shalt.err (!%p388_p6)
}
  0x29   : > { %323 = dma.hbm_to_vmem [thread:$0]  (!%p547_p13), %s543_s4, 64, %s551_s6, %s138_s8  }
  0x2a   : > { %p642_p9 = scmp.lt.s32.totalorder %s456_s15, 3  ;;  %p643_p7 = scmp.ge.s32.totalorder %s456_s15, 1 }
  0x2c   : > { %p154_p0 = pnand %p643_p7, %p642_p9 }
  0x2d   : > { %s578_s29 = sand.u32 (!%p154_p0), 1, %s448_s13   ;;  %p644_p6 = scmp.ne.s32.totalorder (!%p154_p0), %s638_s23, 0 }
  0x2e   : > { %157 = sbr.rel (%p154_p0) target bundleno = 378 (0x17a), region = 32  ;;  %s310_s30 = sshll.u32 (!%p154_p0), %s578_s29, 2 }
  0x2f   : > { %s160_s5 = scalar_lea.sflag (!%p154_p0), [#allocation3], %s578_s29  ;;  %s163_s7 = scalar_lea.vmem (!%p154_p0), [#allocation2], %s310_s30 }
  0x33   : > { %435 = dma.done.wait (%p644_p6), %s160_s5, 64  }
  0x34   : > { %437 = vsyncadd (%p644_p6), %s160_s5, 4294967232  ;;  %v186_v0 = vld [vmem:[%s163_s7] sm:$0xf]  ;;  %vm188_vm0 = vcmask 261120   ;;  %v205_v11 = vlaneseq  ;;  %s313_s9 = sshll.u32 %s501_s16, 6  ;;  %s185_s10 = scalar_lea.vmem [#allocation5], %s310_s30 }
  0x35   : > { %v187_v1 = vunpack.c.l.bf16 %v186_v0  ;;  %v203_v13 = vld [vmem:[%s632_s1] sm:$0x1]  ;;  %s234_s11 = sshll.u32 %s185_s10, 4  ;;  %vm218_vm1 = vcmask 257024   ;;  %s232_s20 = scalar_lea.hbm %s634_s3, %s313_s9  ;;  %s235_s11 = int_to_ptr.vmem [resolvable:$true] %s234_s11 }
  0x36   : > { %v206_v12 = vshrl.u32 %v205_v11, 7  ;;  %v210_v14 = vld [vmem:[%s633_s2] sm:$0x1]  ;;  %v204_v15 = vunpack.c.l.bf16 %v203_v13  ;;  %s221_s22 = scalar_lea.sflag [#allocation4], %s578_s29  ;;  %s392_s26 = scalar_lea.vmem %s235_s11, 64 }
  0x37   : > { %v189_v2 = vsel %vm188_vm0, %v187_v1, 0.0  ;;  %v211_v17 = vunpack.c.l.bf16 %v210_v14  ;;  %p393_p11 = scmp.ne.s32.totalorder %s235_s11, %s392_s26  ;;  %p645_p12 = scmp.ne.s32.totalorder %s639_s24, 0 }
  0x38   : > { %190 = vadd.xlane.f32.xlu0 %v189_v2  ;;  %v207_v16 = vsub.s32 0, %v206_v12  ;;  %s459_s27 = smov [#allocation5]  }
  0x39   : > { %p394_p13 = pnand %p393_p11, %p645_p12  ;;  %s396_s16 = sshll.u32 %s459_s27, 4  ;;  %s397_s16 = int_to_ptr.vmem [resolvable:$false] %s396_s16 }
  0x3a   : > { %v208_v18 = vrot.slane %v204_v15, %v207_v16  ;;  %v215_v21 = vrot.slane %v211_v17, %v207_v16  ;;  %s398_s28 = scalar_lea.vmem %s397_s16, 128  ;;  %p399_p3 = scmp.lt.s32.totalorder %s235_s11, %s397_s16 }
  0x3b   : > { %p395_p1 = pneg %p394_p13  ;;  %p400_p5 = scmp.lt.s32.totalorder %s398_s28, %s392_s26 }
  0x3d   : > { %p401_p8 = por %p400_p5, %p399_p3 }
  0x3f   : > { %p402_p10 = pnand %p401_p8, %p395_p1 }
  0xc1   : > { %v191_v3 = vpop.xlane.xlu0 %190 }
  0xc2   : > { %v193_v4 = vmul.f32 0.03125, %v191_v3 }
  0xc4   : > { %v194_v5 = vsub.f32 %v187_v1, %v193_v4 }
  0xc6   : > { %v195_v6 = vmul.f32 %v194_v5, %v194_v5 }
  0xc8   : > { %v196_v7 = vsel %vm188_vm0, %v195_v6, 0.0 }
  0xc9   : > { %197 = vadd.xlane.f32.xlu0 %v196_v7 }
 0x152   : > { %v198_v8 = vpop.xlane.xlu0 %197 }
 0x153   : > { %v199_v9 = vmul.f32 0.03125, %v198_v8 }
 0x155   : > { %v200_v10 = vadd.f32 1e-12, %v199_v9 }
 0x157   : > { %362 = vrsqrt.f32 %v200_v10 }
 0x164   : > { %v363_v19 = vpop.eup %362 }
 0x165   : > { %v202_v20 = vmul.f32 %v363_v19, %v194_v5 }
 0x167   : > { %v209_v22 = vmul.f32 %v208_v18, %v202_v20 }
 0x169   : > { %v216_v23 = vadd.f32 %v215_v21, %v209_v22 }
 0x16b   : > { %v217_v24 = vpack.c.bf16 %v216_v23, %v216_v23 }
 0x16d   : > { %219 = vst.msk [vmem:[%s185_s10] sm:$0xf] %vm218_vm1, %v217_v24 }
 0x16e   : > { %405 = shalt.err (!%p402_p10)
}
 0x16f   : > { %s406_s30 = scalar_lea.hbm %s232_s20, 64  ;;  %s410_s7 = scalar_lea.hbm %s634_s3, 128 }
 0x170   : > { %p407_p2 = scmp.ne.s32.totalorder %s232_s20, %s406_s30  ;;  %p411_p7 = scmp.lt.s32.totalorder %s232_s20, %s634_s3 }
 0x171   : > { %p412_p0 = scmp.lt.s32.totalorder %s410_s7, %s406_s30 }
 0x172   : > { %p408_p4 = pnand %p407_p2, %p645_p12 }
 0x173   : > { %p413_p6 = por %p412_p0, %p411_p7 }
 0x174   : > { %p409_p9 = pneg %p408_p4 }
 0x176   : > { %p414_p11 = pnand %p413_p6, %p409_p9 }
 0x178   : > { %417 = shalt.err (!%p414_p11)
}
 0x179   : > { %318 = dma.vmem_to_hbm [thread:$0]  (%p645_p12), %s235_s11, 64, %s232_s20, %s221_s22  }
 0x17a PF: > { %s246_s6 = sand.u32 1, %s444_s12   ;;  %p646_p13 = scmp.ne.s32.totalorder %s640_s25, 0 }
 0x17b   : > { %p647_p1 = scmp.ge.s32.totalorder %s456_s15, 2  ;;  %s247_s8 = scalar_lea.sflag [#allocation4], %s246_s6 }
 0x17d   : > { %p325_p3 = pnand %p647_p1, %p646_p13 }
 0x17f   : > { %p326_p5 = pneg %p325_p3 }
 0x181   : > { %439 = dma.done.wait (%p326_p5), %s247_s8, 64  }
 0x182   : > { %441 = vsyncadd (%p326_p5), %s247_s8, 4294967232  ;;  %p16_p8 = scmp.ge.s32.totalorder %s505_s18, 4   ;;  %s648_s12 = smov %s448_s13 }
 0x183   : > { %s649_s13 = smov %s452_s14  ;;  %s650_s14 = smov %s517_s21 }
 0x184   : > { %s651_s15 = smov %s505_s18  ;;  %18 = sbr.rel (!%p16_p8) target bundleno = 5 (0x5), region = 77 }
 0x189   :  { %252 = vsyncpa [#allocation3], 1 }
 0x18a   :  { %254 = vsyncpa [#allocation3 + $0x1], 1 }
 0x18b   :  { %255 = vsyncpa [#allocation4], 1 }
 0x18c   :  { %257 = vsyncpa [#allocation4 + $0x1], 1 }

</bundles_post_ra>
